<compile_context>
chip_gen: v7x
topology: tpu7x:2x2x1
jax: 0.10.0
libtpu: 0.0.40
codegen_flags: <defaults>
</compile_context>

<pallas_src>
import functools

import jax
import jax.numpy as jnp
from jax.experimental import pallas as pl
from jax.experimental.pallas import tpu as pltpu

_LANE = 128
_SUBLANE = 8


def _round_up(x, m):
    return ((x + m - 1) // m) * m


# ---------------------------------------------------------------------------
# Kernel 1: modality projections + gate (small; everything resident in VMEM).
# ---------------------------------------------------------------------------
def _head_kernel(m1_ref, m2_ref, w1_ref, w2_ref, wg1_ref, wg2_ref,
                 o2_ref, d_ref, gate_ref):
    o1 = jnp.tanh(
        jnp.dot(m1_ref[...], w1_ref[...], preferred_element_type=jnp.float32)
    )  # [B, O]
    o2 = jnp.tanh(
        jnp.dot(m2_ref[...], w2_ref[...], preferred_element_type=jnp.float32)
    )  # [B, O]

    # gate = sigmoid(cat([o1, o2], 1) @ wg) computed as two VPU multiplies +
    # lane reductions (an MXU matmul with N=1 would waste a padded MXU pass).
    z = (jnp.sum(o1 * wg1_ref[...], axis=-1, keepdims=True) +
         jnp.sum(o2 * wg2_ref[...], axis=-1, keepdims=True))          # [B, 1]
    gate_ref[...] = jax.nn.sigmoid(z)

    o2_ref[...] = o2
    d_ref[...] = o1 - o2          # blend becomes o2 + gate * d


# ---------------------------------------------------------------------------
# Kernel 2: gated blend (the dominant O(B^2*O) HBM writeback), gridded with
# the column (j) axis OUTER and the row (r) axis INNER.
# ---------------------------------------------------------------------------
def _blend_kernel(gate_ref, o2_ref, d_ref, out_ref):
    # out[r, j, c] = o2[j, c] + gate[r] * (o1[j, c] - o2[j, c])
    #   gate_ref : (tr, 1, 1)   row tile of the gate
    #   o2 / d   : (cb, O)      column tile; block index constant across the
    #                            inner row loop -> fetched once per column step
    #   out_ref  : (tr, cb, O)  double-buffered store path
    gate = gate_ref[...]                          # (tr, 1, 1)
    o2 = o2_ref[...][None, :, :]                  # (1, cb, O)
    d = d_ref[...][None, :, :]                    # (1, cb, O)
    out_ref[...] = (o2 + gate * d).astype(out_ref.dtype)


# ---------------------------------------------------------------------------
# Generation-aware VMEM budgeting / tile selection.
# ---------------------------------------------------------------------------
def _vmem_caps():
    """Returns (block_budget_bytes, vmem_limit_bytes) for this generation."""
    try:
        cap = int(pltpu.get_tpu_info().vmem_capacity_bytes)
    except Exception:
        cap = 64 * 1024 * 1024        # conservative fallback: v7x per-core VMEM
    return int(cap * 0.70), int(cap * 0.90)


def _pick_tiles(batch, out_dim, out_itemsize, block_budget):
    """Pick (row_tile tr, col_tile cb), charging everything the pipeline buffers.

    Per grid step (double-buffered by the pipeline):
      out   : 2 * tr * round8(cb) * round128(O) * out_itemsize
      o2, d : 2 * 2 * round8(cb) * round128(O) * 4
      gate  : 2 * tr * (8*128*4)     # each (tr,1,1) row pads to one f32 tile
    """
    o_pad = _round_up(out_dim, _LANE)
    # Column tile over the `j` axis of o2/d: ~2 MiB per buffer, capped at B,
    # kept a multiple of 8 (sublane alignment) unless it covers the full batch.
    target = max(_SUBLANE, ((2 << 20) // (o_pad * 4)) // _SUBLANE * _SUBLANE)
    cb = batch if target >= batch else target
    cb_pad = _round_up(cb, _SUBLANE)

    flat_bytes = 2 * 2 * cb_pad * o_pad * 4
    per_row = 2 * cb_pad * o_pad * out_itemsize + 2 * _SUBLANE * _LANE * 4
    tr = max(1, (block_budget - flat_bytes) // per_row)
    tr = int(min(tr, batch))
    return tr, int(cb)


# ---------------------------------------------------------------------------
# Forward wrapper.
# ---------------------------------------------------------------------------
@functools.partial(jax.jit,
                   static_argnames=("row_tile", "col_tile", "out_dtype"))
def gated_bimodal_forward(m1, m2, w1, w2, wg, *, row_tile=None, col_tile=None,
                          out_dtype=jnp.float32):
    """m1:[B,in1], m2:[B,in2], w1:[in1,O], w2:[in2,O], wg:[2*O,1] (pre-transposed)."""
    B = m1.shape[0]
    O1, O2 = w1.shape[1], w2.shape[1]
    assert O1 == O2, "the gated sum requires output_one_size == output_two_size"
    O = O1

    # cat([o1, o2], 1) @ wg == o1 @ wg[:O] + o2 @ wg[O:]; pass each half as a
    # [1, O] row so the head can use VPU multiply + lane reduction.
    wg1_row = wg[:O, :].reshape(1, O)
    wg2_row = wg[O:, :].reshape(1, O)

    # ---- Kernel 1: head (tiny, grid-less; all operands resident in VMEM) ----
    o2, d, gate = pl.pallas_call(
        _head_kernel,
        out_shape=(
            jax.ShapeDtypeStruct((B, O), jnp.float32),   # o2
            jax.ShapeDtypeStruct((B, O), jnp.float32),   # d = o1 - o2
            jax.ShapeDtypeStruct((B, 1), jnp.float32),   # gate
        ),
        in_specs=[pl.BlockSpec(memory_space=pltpu.MemorySpace.VMEM)] * 6,
        out_specs=(
            pl.BlockSpec(memory_space=pltpu.MemorySpace.VMEM),
            pl.BlockSpec(memory_space=pltpu.MemorySpace.VMEM),
            pl.BlockSpec(memory_space=pltpu.MemorySpace.VMEM),
        ),
    )(m1, m2, w1, w2, wg1_row, wg2_row)

    # Tiny layout plumbing (B floats) so the blend can broadcast gate per row.
    gate3 = gate.reshape(B, 1, 1)

    # ---- Kernel 2: gridded gated blend ----
    block_budget, vmem_limit = _vmem_caps()
    out_itemsize = jnp.dtype(out_dtype).itemsize
    tr, cb = _pick_tiles(B, O, out_itemsize, block_budget)
    if row_tile is not None:
        tr = max(1, min(int(row_tile), B))
    if col_tile is not None:
        cb = max(1, min(int(col_tile), B))
    # (8,128) rule: the block's second-minor dim must be a multiple of 8 or
    # the full dim; the minor dim is always the full O.
    assert cb == B or cb % _SUBLANE == 0, (B, cb)

    n_col = pl.cdiv(B, cb)
    n_row = pl.cdiv(B, tr)

    out = pl.pallas_call(
        _blend_kernel,
        out_shape=jax.ShapeDtypeStruct((B, B, O), out_dtype),
        grid_spec=pltpu.PrefetchScalarGridSpec(
            num_scalar_prefetch=0,
            # Column axis OUTER, row axis INNER: o2/d block indices are
            # constant across the inner row loop (no re-fetch per row tile).
            grid=(n_col, n_row),
            in_specs=[
                pl.BlockSpec((tr, 1, 1), lambda c, r: (r, 0, 0)),   # gate
                pl.BlockSpec((cb, O), lambda c, r: (c, 0)),         # o2
                pl.BlockSpec((cb, O), lambda c, r: (c, 0)),         # d
            ],
            out_specs=pl.BlockSpec((tr, cb, O), lambda c, r: (r, c, 0)),
        ),
        compiler_params=pltpu.CompilerParams(
            dimension_semantics=("parallel", "parallel"),
            vmem_limit_bytes=vmem_limit,
        ),
        cost_estimate=pl.CostEstimate(
            flops=2 * B * B * O,
            transcendentals=0,
            bytes_accessed=B * B * O * out_itemsize + 2 * B * O * 4 + B * 4,
        ),
    )(gate3, o2, d)
    return out


def _reference(m1, m2, w1, w2, wg):
    """Pure-JAX mirror of the PyTorch forward (including the [B,B,O] broadcast)."""
    o1 = jnp.tanh(m1 @ w1)
    o2 = jnp.tanh(m2 @ w2)
    gate = jax.nn.sigmoid(jnp.concatenate([o1, o2], axis=1) @ wg)   # [B, 1]
    g = gate[:, :, None]                                            # [B, 1, 1]
    return g * o1[None, :, :] + (1.0 - g) * o2[None, :, :]          # [B, B, O]


if __name__ == "__main__":
    # Small, deterministic shapes consistent with the module.
    B = 32
    IN1, IN2 = 48, 64
    O1 = O2 = 32            # must match for the gated sum
    key = jax.random.PRNGKey(0)
    k1, k2, k3, k4, k5 = jax.random.split(key, 5)

    m1 = jax.random.normal(k1, (B, IN1), dtype=jnp.float32)
    m2 = jax.random.normal(k2, (B, IN2), dtype=jnp.float32)

    # PyTorch Linear-style uniform init (bias=False), stored pre-transposed [in, out].
    def init_w(k, fan_in, fan_out):
        bound = 1.0 / jnp.sqrt(jnp.float32(fan_in))
        return jax.random.uniform(
            k, (fan_in, fan_out), dtype=jnp.float32, minval=-bound, maxval=bound
        )

    w1 = init_w(k3, IN1, O1)            # fc_one.weight.T
    w2 = init_w(k4, IN2, O2)            # fc_two.weight.T
    wg = init_w(k5, O1 + O2, 1)         # hidden_sigmoid.weight.T

    ref = _reference(m1, m2, w1, w2, wg)

    # Explicit small tiles -> grid (2, 4): exercises the pipelined path.
    out = gated_bimodal_forward(m1, m2, w1, w2, wg, row_tile=8, col_tile=16)
    out = jax.block_until_ready(out)
    assert out.shape == (B, B, O1), out.shape
    assert jnp.allclose(out, ref, atol=1e-5, rtol=1e-5), float(
        jnp.max(jnp.abs(out - ref)))

    # Auto (generation-aware VMEM-budgeted) tiling path.
    out_auto = gated_bimodal_forward(m1, m2, w1, w2, wg)
    out_auto = jax.block_until_ready(out_auto)
    assert jnp.allclose(out_auto, ref, atol=1e-5, rtol=1e-5), float(
        jnp.max(jnp.abs(out_auto - ref)))

    print("KERNEL_OK")
</pallas_src>

<mosaic_0001>
module attributes {stable_mosaic.version = 11 : i64} {
  func.func @_head_kernel(%arg0: memref<32x48xf32, #tpu.memory_space<vmem>>, %arg1: memref<32x64xf32, #tpu.memory_space<vmem>>, %arg2: memref<48x32xf32, #tpu.memory_space<vmem>>, %arg3: memref<64x32xf32, #tpu.memory_space<vmem>>, %arg4: memref<1x32xf32, #tpu.memory_space<vmem>>, %arg5: memref<1x32xf32, #tpu.memory_space<vmem>>, %arg6: memref<32x32xf32, #tpu.memory_space<vmem>>, %arg7: memref<32x32xf32, #tpu.memory_space<vmem>>, %arg8: memref<32x1xf32, #tpu.memory_space<vmem>>) attributes {dimension_semantics = [], scalar_prefetch = 0 : i64, scratch_operands = 0 : i64, tpu.core_type = #tpu.core_type<tc>} {
    %c0 = arith.constant 0 : index
    %c0_0 = arith.constant 0 : index
    %0 = vector.load %arg0[%c0, %c0_0] : memref<32x48xf32, #tpu.memory_space<vmem>>, vector<32x48xf32>
    %c0_1 = arith.constant 0 : index
    %c0_2 = arith.constant 0 : index
    %1 = vector.load %arg2[%c0_1, %c0_2] : memref<48x32xf32, #tpu.memory_space<vmem>>, vector<48x32xf32>
    %cst = arith.constant dense<0.000000e+00> : vector<32x32xf32>
    %2 = tpu.matmul %0, %1, %cst {dimension_numbers = #tpu.dot_dimension_numbers<[1], [0], [0], [1], [0, 0, 1, 1], [], []>} : vector<32x48xf32>, vector<48x32xf32>, vector<32x32xf32> -> vector<32x32xf32>
    %3 = math.tanh %2 : vector<32x32xf32>
    %c0_3 = arith.constant 0 : index
    %c0_4 = arith.constant 0 : index
    %4 = vector.load %arg1[%c0_3, %c0_4] : memref<32x64xf32, #tpu.memory_space<vmem>>, vector<32x64xf32>
    %c0_5 = arith.constant 0 : index
    %c0_6 = arith.constant 0 : index
    %5 = vector.load %arg3[%c0_5, %c0_6] : memref<64x32xf32, #tpu.memory_space<vmem>>, vector<64x32xf32>
    %cst_7 = arith.constant dense<0.000000e+00> : vector<32x32xf32>
    %6 = tpu.matmul %4, %5, %cst_7 {dimension_numbers = #tpu.dot_dimension_numbers<[1], [0], [0], [1], [0, 0, 1, 1], [], []>} : vector<32x64xf32>, vector<64x32xf32>, vector<32x32xf32> -> vector<32x32xf32>
    %7 = math.tanh %6 : vector<32x32xf32>
    %c0_8 = arith.constant 0 : index
    %c0_9 = arith.constant 0 : index
    %8 = vector.load %arg4[%c0_8, %c0_9] : memref<1x32xf32, #tpu.memory_space<vmem>>, vector<1x32xf32>
    %9 = vector.broadcast %8 : vector<1x32xf32> to vector<32x32xf32>
    %10 = arith.mulf %3, %9 : vector<32x32xf32>
    %cst_10 = arith.constant dense<0.000000e+00> : vector<32xf32>
    %11 = vector.multi_reduction <add>, %10, %cst_10 [1] : vector<32x32xf32> to vector<32xf32>
    %12 = vector.shape_cast %11 : vector<32xf32> to vector<32x1xf32>
    %c0_11 = arith.constant 0 : index
    %c0_12 = arith.constant 0 : index
    %13 = vector.load %arg5[%c0_11, %c0_12] : memref<1x32xf32, #tpu.memory_space<vmem>>, vector<1x32xf32>
    %14 = vector.broadcast %13 : vector<1x32xf32> to vector<32x32xf32>
    %15 = arith.mulf %7, %14 : vector<32x32xf32>
    %cst_13 = arith.constant dense<0.000000e+00> : vector<32xf32>
    %16 = vector.multi_reduction <add>, %15, %cst_13 [1] : vector<32x32xf32> to vector<32xf32>
    %17 = vector.shape_cast %16 : vector<32xf32> to vector<32x1xf32>
    %18 = arith.addf %12, %17 : vector<32x1xf32>
    %19 = arith.negf %18 : vector<32x1xf32>
    %20 = math.exp %19 : vector<32x1xf32>
    %cst_14 = arith.constant 1.000000e+00 : f32
    %21 = vector.broadcast %cst_14 : f32 to vector<32x1xf32>
    %22 = arith.addf %21, %20 : vector<32x1xf32>
    %23 = arith.divf %21, %22 : vector<32x1xf32>
    %c0_15 = arith.constant 0 : index
    %c0_16 = arith.constant 0 : index
    %24 = vector.load %arg8[%c0_15, %c0_16] : memref<32x1xf32, #tpu.memory_space<vmem>>, vector<32x1xf32>
    tpu.vector_store %arg8[%c0_15, %c0_16], %23 {strides = array<i32>} : memref<32x1xf32, #tpu.memory_space<vmem>>, vector<32x1xf32>,
    %c0_17 = arith.constant 0 : index
    %c0_18 = arith.constant 0 : index
    %25 = vector.load %arg6[%c0_17, %c0_18] : memref<32x32xf32, #tpu.memory_space<vmem>>, vector<32x32xf32>
    tpu.vector_store %arg6[%c0_17, %c0_18], %7 {strides = array<i32>} : memref<32x32xf32, #tpu.memory_space<vmem>>, vector<32x32xf32>,
    %26 = arith.subf %3, %7 : vector<32x32xf32>
    %c0_19 = arith.constant 0 : index
    %c0_20 = arith.constant 0 : index
    %27 = vector.load %arg7[%c0_19, %c0_20] : memref<32x32xf32, #tpu.memory_space<vmem>>, vector<32x32xf32>
    tpu.vector_store %arg7[%c0_19, %c0_20], %26 {strides = array<i32>} : memref<32x32xf32, #tpu.memory_space<vmem>>, vector<32x32xf32>,
    return
  }
}

module attributes {stable_mosaic.version = 11 : i64} {
  func.func @_blend_kernel(%arg0: i32, %arg1: i32, %arg2: memref<8x1x1xf32, #tpu.memory_space<vmem>>, %arg3: memref<16x32xf32, #tpu.memory_space<vmem>>, %arg4: memref<16x32xf32, #tpu.memory_space<vmem>>, %arg5: memref<8x16x32xf32, #tpu.memory_space<vmem>>) attributes {dimension_semantics = [#tpu.dimension_semantics<parallel>, #tpu.dimension_semantics<parallel>], iteration_bounds = array<i64: 2, 4>, scalar_prefetch = 0 : i64, scratch_operands = 0 : i64, tpu.core_type = #tpu.core_type<tc>, window_params = [{transform_indices = @transform_0, window_bounds = array<i64: 8, 1, 1>}, {transform_indices = @transform_1, window_bounds = array<i64: 16, 32>}, {transform_indices = @transform_2, window_bounds = array<i64: 16, 32>}, {transform_indices = @transform_3, window_bounds = array<i64: 8, 16, 32>}]} {
    %c0 = arith.constant 0 : index
    %c0_0 = arith.constant 0 : index
    %c0_1 = arith.constant 0 : index
    %0 = vector.load %arg2[%c0, %c0_0, %c0_1] : memref<8x1x1xf32, #tpu.memory_space<vmem>>, vector<8x1x1xf32>
    %c0_2 = arith.constant 0 : index
    %c0_3 = arith.constant 0 : index
    %1 = vector.load %arg3[%c0_2, %c0_3] : memref<16x32xf32, #tpu.memory_space<vmem>>, vector<16x32xf32>
    %2 = vector.shape_cast %1 : vector<16x32xf32> to vector<1x16x32xf32>
    %c0_4 = arith.constant 0 : index
    %c0_5 = arith.constant 0 : index
    %3 = vector.load %arg4[%c0_4, %c0_5] : memref<16x32xf32, #tpu.memory_space<vmem>>, vector<16x32xf32>
    %4 = vector.shape_cast %3 : vector<16x32xf32> to vector<1x16x32xf32>
    %5 = vector.broadcast %0 : vector<8x1x1xf32> to vector<8x16x32xf32>
    %6 = vector.broadcast %4 : vector<1x16x32xf32> to vector<8x16x32xf32>
    %7 = arith.mulf %5, %6 : vector<8x16x32xf32>
    %8 = vector.broadcast %2 : vector<1x16x32xf32> to vector<8x16x32xf32>
    %9 = arith.addf %8, %7 : vector<8x16x32xf32>
    %c0_6 = arith.constant 0 : index
    %c0_7 = arith.constant 0 : index
    %c0_8 = arith.constant 0 : index
    %10 = vector.load %arg5[%c0_6, %c0_7, %c0_8] : memref<8x16x32xf32, #tpu.memory_space<vmem>>, vector<8x16x32xf32>
    tpu.vector_store %arg5[%c0_6, %c0_7, %c0_8], %9 {strides = array<i32>} : memref<8x16x32xf32, #tpu.memory_space<vmem>>, vector<8x16x32xf32>,
    return
  }
  func.func @transform_0(%arg0: i32, %arg1: i32) -> (i32, i32, i32) {
    %c0_i32 = arith.constant 0 : i32
    %c0_i32_0 = arith.constant 0 : i32
    %c0_i32_1 = arith.constant 0 : i32
    return %arg1, %c0_i32, %c0_i32_0 : i32, i32, i32
  }
  func.func @transform_1(%arg0: i32, %arg1: i32) -> (i32, i32) {
    %c0_i32 = arith.constant 0 : i32
    %c0_i32_0 = arith.constant 0 : i32
    return %arg0, %c0_i32 : i32, i32
  }
  func.func @transform_2(%arg0: i32, %arg1: i32) -> (i32, i32) {
    %c0_i32 = arith.constant 0 : i32
    %c0_i32_0 = arith.constant 0 : i32
    return %arg0, %c0_i32 : i32, i32
  }
  func.func @transform_3(%arg0: i32, %arg1: i32) -> (i32, i32, i32) {
    %c0_i32 = arith.constant 0 : i32
    %c0_i32_0 = arith.constant 0 : i32
    return %arg1, %arg0, %c0_i32 : i32, i32, i32
  }
}

</mosaic_0001>

<bundles_post_ra>
// kernel: gated_bimodal_forward.3
= control target key start
LH: loop header
LB: loop body
LE: loop exit
PB: predicated region body
PF: predicated region fallthrough
CT: control target
= control target key end

     0   :  { %8 = vsyncpa [#allocation3], 0  ;;  %s887_s0 = inlined_call_operand.vmem [shape: f32[32,1,1], index: 0, kind: input, shape index: {}]   ;;  %s888_s1 = inlined_call_operand.vmem [shape: f32[32,32], index: 1, kind: input, shape index: {}]   ;;  %s889_s2 = inlined_call_operand.vmem [shape: f32[32,32], index: 2, kind: input, shape index: {}]   ;;  %s890_s3 = inlined_call_operand.hbm [shape: f32[32,32,32], index: 3, kind: output, shape index: {}]  }
   0x1   :  { %10 = vsyncpa [#allocation3 + $0x1], 0  ;;  %s714_s12 = smov 0   ;;  %s716_s13 = smov 0  }
   0x2   :  { %s718_s14 = smov 0   ;;  %s720_s15 = smov 0  }
   0x3   :  { %s722_s16 = smov 0   ;;  %s724_s17 = smov 0  }
   0x4   :  { %s726_s18 = smov 0   ;;  %s728_s19 = smov 0  }
   0x5 LB: > { %s504_s20 = sadd.s32 4294967295, %s684_s19   ;;  %s505_s21 = sadd.s32 4294967294, %s684_s19   ;;  %s684_s19 = sphi %s728_s19, %s16_s19   ;;  %s680_s18 = sphi %s726_s18, %s899_s18   ;;  %s676_s17 = sphi %s724_s17, %s898_s17   ;;  %s672_s16 = sphi %s722_s16, %s897_s16   ;;  %s668_s15 = sphi %s720_s15, %s896_s15   ;;  %s664_s14 = sphi %s718_s14, %s895_s14   ;;  %s660_s13 = sphi %s716_s13, %s894_s13   ;;  %s656_s12 = sphi %s714_s12, %s893_s12  }
   0x6   : > { %s25_s22 = sadd.s32 1, %s676_s17  ;;  %s28_s23 = sadd.s32 1, %s680_s18 }
   0x7   : > { %p26_p0 = scmp.ge.s32.totalorder %s25_s22, 4  ;;  %p125_p1 = scmp.ne.s32.totalorder %s664_s14, %s660_s13 }
   0x8   : > { %p126_p2 = scmp.eq.s32.totalorder %s504_s20, 7  ;;  %p131_p5 = scmp.ne.s32.totalorder %s660_s13, %s656_s12 }
   0x9   : > { %s901_s22 = smov (%p26_p0, %s25_s22), 0  ;;  %s903_s23 = smov (!%p26_p0, %s28_s23), %s680_s18 }
   0xa   : > { %s110_s24 = ssub.s32 %s676_s17, %s901_s22  ;;  %p765_p3 = por %p126_p2, %p125_p1 }
   0xb   : > { %p30_p4 = scmp.ge.s32.totalorder %s903_s23, 2  ;;  %p132_p6 = scmp.eq.s32.totalorder %s505_s21, 7 }
   0xc   : > { %p508_p7 = scmp.ge.s32.totalorder %s684_s19, 1  ;;  %p176_p9 = scmp.lt.s32.totalorder %s684_s19, 9 }
   0xd   : > { %s905_s23 = smov (%p30_p4, %s903_s23), 0  ;;  %p774_p8 = por %p132_p6, %p131_p5 }
   0xe   : > { %s111_s27 = ssub.s32 %s680_s18, %s905_s23  ;;  %s115_s28 = sadd.s32 1, %s664_s14 }
   0xf   : > { %s112_s29 = sor.u32 %s111_s27, %s110_s24  ;;  %p177_p10 = pnand %p508_p7, %p176_p9 }
  0x10   : > { %p113_p11 = scmp.eq.s32.totalorder %s112_s29, 0  ;;  %s510_s4 = sshll.u32 (!%p177_p10), %s668_s15, 3  ;;  %v686_v0 = vmov (!%p177_p10), 0   ;;  %vm344_vm0 = vcmask (!%p177_p10), 261120  }
  0x11   : > { %180 = sbr.rel (%p177_p10) target bundleno = 183 (0xb7), region = 32  ;;  %617 = vset.pattern.permute.xlu1 (!%p177_p10), %v686_v0  ;;  %616 = vset.pattern.permute.xlu0 (!%p177_p10), %v686_v0  ;;  %p210_p12 = scmp.lt.s32.totalorder (!%p177_p10), %s510_s4, 31 }
  0x12   : > { %s783_s30 = scalar_select %p113_p11, %s664_s14, %s115_s28  }
  0x13   : > { %s206_s8 = sand.u32 (!%p177_p10), 1, %s660_s13   ;;  %s791_s9 = sshll.u32 (!%p177_p10), %s672_s16, 1 }
  0x14   : > { %p215_p13 = scmp.lt.s32.totalorder (!%p177_p10), %s791_s9, 3  ;;  %s362_s5 = scalar_lea.sflag (!%p177_p10), [#allocation3], %s206_s8 }
  0x18   : > { %s907_s4 = smov (!%p210_p12, %s510_s4), 31 }
  0x19   : > { %s212_s7 = scalar_lea.vmem %s887_s0, %s907_s4  ;;  %s509_s4 = sshll.u32 %s206_s8, 7 }
  0x1a   : > { %v517_v1 = vld [vmem:[%s212_s7 + $0x2] ss:$0 sm:$0xff]  ;;  %v515_v2 = vld [vmem:[%s212_s7] ss:$0 sm:$0xff]  ;;  %v518_v3 = vld [vmem:[%s212_s7 + $0x3] ss:$0 sm:$0xff] }
  0x1b   : > { %289 = vperm.xlu1 %617, %v517_v1   ;;  %281 = vperm.xlu0 %616, %v515_v2   ;;  %v516_v4 = vld [vmem:[%s212_s7 + $0x1] ss:$0 sm:$0xff]  ;;  %v520_v5 = vld [vmem:[%s212_s7 + $0x5] ss:$0 sm:$0xff]  ;;  %v519_v6 = vld [vmem:[%s212_s7 + $0x4] ss:$0 sm:$0xff] }
  0x1c   : > { %v522_v7 = vld [vmem:[%s212_s7 + $0x7] ss:$0 sm:$0xff]  ;;  %v521_v8 = vld [vmem:[%s212_s7 + $0x6] ss:$0 sm:$0xff]  ;;  %s216_s10 = scalar_select %p215_p13, %s791_s9, 3 }
  0x1d   : > { %s803_s16 = scalar_lea.vmem [#allocation2], %s509_s4 }
  0x1e   : > { %s512_s11 = sshll.u32 %s216_s10, 3 }
  0x1f   : > { %293 = vperm.xlu1 %617, %v518_v3   ;;  %285 = vperm.xlu0 %616, %v516_v4   ;;  %s224_s24 = scalar_lea.vmem %s889_s2, %s512_s11  ;;  %s218_s29 = scalar_lea.vmem %s888_s1, %s512_s11 }
  0x20   : > { %v238_v9 = vld [vmem:[%s224_s24] sm:$0xff]  ;;  %v239_v10 = vld [vmem:[%s224_s24 + $0x8] sm:$0xff] }
  0x21   : > { %v236_v11 = vld [vmem:[%s218_s29] sm:$0xff]  ;;  %v237_v12 = vld [vmem:[%s218_s29 + $0x8] sm:$0xff] }
  0x23   : > { %301 = vperm.xlu1 %617, %v520_v5   ;;  %297 = vperm.xlu0 %616, %v519_v6  }
  0x27   : > { %309 = vperm.xlu1 %617, %v522_v7   ;;  %305 = vperm.xlu0 %616, %v521_v8  }
  0x9a   : > { %v290_v13 = vpop.permute.xlu1 %289  ;;  %v282_v14 = vpop.permute.xlu0 %281 }
  0x9b   : > { %v316_v15 = vmul.f32 %v290_v13, %v238_v9  ;;  %v317_v16 = vmul.f32 %v290_v13, %v239_v10  ;;  %v312_v17 = vmul.f32 %v282_v14, %v238_v9  ;;  %v313_v18 = vmul.f32 %v282_v14, %v239_v10 }
  0x9d   : > { %v332_v19 = vadd.f32 %v316_v15, %v236_v11  ;;  %v333_v20 = vadd.f32 %v317_v16, %v237_v12  ;;  %v328_v21 = vadd.f32 %v312_v17, %v236_v11  ;;  %v329_v22 = vadd.f32 %v313_v18, %v237_v12 }
  0x9e   : > { %v294_v23 = vpop.permute.xlu1 %293  ;;  %v286_v24 = vpop.permute.xlu0 %285 }
  0x9f   : > { %349 = vst.msk [vmem:[%s803_s16 + $0x20] sm:$0xff] %vm344_vm0, %v332_v19  ;;  %350 = vst.msk [vmem:[%s803_s16 + $0x28] sm:$0xff] %vm344_vm0, %v333_v20  ;;  %v318_v25 = vmul.f32 %v294_v23, %v238_v9  ;;  %v319_v26 = vmul.f32 %v294_v23, %v239_v10  ;;  %v314_v27 = vmul.f32 %v286_v24, %v238_v9 }
  0xa0   : > { %345 = vst.msk [vmem:[%s803_s16] sm:$0xff] %vm344_vm0, %v328_v21  ;;  %346 = vst.msk [vmem:[%s803_s16 + $0x8] sm:$0xff] %vm344_vm0, %v329_v22  ;;  %v315_v28 = vmul.f32 %v286_v24, %v239_v10 }
  0xa1   : > { %v334_v29 = vadd.f32 %v318_v25, %v236_v11  ;;  %v335_v30 = vadd.f32 %v319_v26, %v237_v12  ;;  %v330_v31 = vadd.f32 %v314_v27, %v236_v11 }
  0xa2   : > { %v331_v32 = vadd.f32 %v315_v28, %v237_v12  ;;  %v302_v33 = vpop.permute.xlu1 %301  ;;  %v298_v34 = vpop.permute.xlu0 %297 }
  0xa3   : > { %351 = vst.msk [vmem:[%s803_s16 + $0x30] sm:$0xff] %vm344_vm0, %v334_v29  ;;  %352 = vst.msk [vmem:[%s803_s16 + $0x38] sm:$0xff] %vm344_vm0, %v335_v30  ;;  %v322_v35 = vmul.f32 %v302_v33, %v238_v9  ;;  %v323_v36 = vmul.f32 %v302_v33, %v239_v10  ;;  %v320_v37 = vmul.f32 %v298_v34, %v238_v9 }
  0xa4   : > { %347 = vst.msk [vmem:[%s803_s16 + $0x10] sm:$0xff] %vm344_vm0, %v330_v31  ;;  %348 = vst.msk [vmem:[%s803_s16 + $0x18] sm:$0xff] %vm344_vm0, %v331_v32  ;;  %v321_v38 = vmul.f32 %v298_v34, %v239_v10 }
  0xa5   : > { %v338_v39 = vadd.f32 %v322_v35, %v236_v11  ;;  %v339_v40 = vadd.f32 %v323_v36, %v237_v12  ;;  %v336_v41 = vadd.f32 %v320_v37, %v236_v11 }
  0xa6   : > { %v337_v42 = vadd.f32 %v321_v38, %v237_v12  ;;  %v310_v43 = vpop.permute.xlu1 %309  ;;  %v306_v44 = vpop.permute.xlu0 %305 }
  0xa7   : > { %355 = vst.msk [vmem:[%s803_s16 + $0x50] sm:$0xff] %vm344_vm0, %v338_v39  ;;  %356 = vst.msk [vmem:[%s803_s16 + $0x58] sm:$0xff] %vm344_vm0, %v339_v40  ;;  %v326_v45 = vmul.f32 %v310_v43, %v238_v9  ;;  %v327_v46 = vmul.f32 %v310_v43, %v239_v10  ;;  %v324_v47 = vmul.f32 %v306_v44, %v238_v9 }
  0xa8   : > { %353 = vst.msk [vmem:[%s803_s16 + $0x40] sm:$0xff] %vm344_vm0, %v336_v41  ;;  %354 = vst.msk [vmem:[%s803_s16 + $0x48] sm:$0xff] %vm344_vm0, %v337_v42  ;;  %v325_v48 = vmul.f32 %v306_v44, %v239_v10 }
  0xa9   : > { %v342_v49 = vadd.f32 %v326_v45, %v236_v11  ;;  %v343_v50 = vadd.f32 %v327_v46, %v237_v12  ;;  %v340_v51 = vadd.f32 %v324_v47, %v236_v11 }
  0xaa   : > { %v341_v52 = vadd.f32 %v325_v48, %v237_v12 }
  0xab   : > { %359 = vst.msk [vmem:[%s803_s16 + $0x70] sm:$0xff] %vm344_vm0, %v342_v49  ;;  %360 = vst.msk [vmem:[%s803_s16 + $0x78] sm:$0xff] %vm344_vm0, %v343_v50 }
  0xac   : > { %357 = vst.msk [vmem:[%s803_s16 + $0x60] sm:$0xff] %vm344_vm0, %v340_v51  ;;  %358 = vst.msk [vmem:[%s803_s16 + $0x68] sm:$0xff] %vm344_vm0, %v341_v52 }
  0xad   : > { %s530_s6 = sshll.u32 %s668_s15, 5  ;;  %s394_s7 = sshll.u32 %s803_s16, 4  ;;  %s395_s7 = int_to_ptr.vmem [resolvable:$true] %s394_s7 }
  0xae   : > { %s375_s10 = sadd.s32 %s530_s6, %s791_s9  ;;  %s687_s8 = smov 256  }
  0xaf   : > { %s527_s11 = sshll.u32 %s375_s10, 7  ;;  %531 = sst [smem:[#allocation5]] (%p765_p3), %s687_s8 }
  0xb0   : > { %s377_s24 = scalar_lea.hbm %s890_s3, %s527_s11  ;;  %s688_s27 = smov 512  }
  0xb1   : > { %532 = sst [smem:[#allocation5 + $0x1]] (%p765_p3), %s688_s27  ;;  %s689_s28 = smov 2  }
  0xb2   : > { %533 = sst [smem:[#allocation5 + $0x2]] (%p765_p3), %s689_s28  ;;  %s690_s15 = smov 128  }
  0xb3   : > { %534 = sst [smem:[#allocation5 + $0x3]] (%p765_p3), %s690_s15  ;;  %s691_s9 = smov 8  }
  0xb4   : > { %535 = sst [smem:[#allocation5 + $0x4]] (%p765_p3), %s690_s15  ;;  %s692_s29 = smov [#allocation4]  }
  0xb5   : > { %536 = sst [smem:[#allocation5 + $0x5]] (%p765_p3), %s691_s9  ;;  %s693_s4 = smov 0  }
  0xb6   : > { %537 = dma.general (%p765_p3), %s395_s7, 2048, %s377_s24, %s362_s5, %s692_s29, [#allocation5], %s693_s4, 0  }
  0xb7 PF: > { %p543_p0 = scmp.ge.s32.totalorder %s684_s19, 2  ;;  %s422_s16 = sand.u32 1, %s656_s12  }
  0xb8   : > { %s423_s6 = scalar_lea.sflag [#allocation3], %s422_s16 }
  0xb9   : > { %p540_p1 = pnand %p543_p0, %p774_p8 }
  0xbb   : > { %651 = dma.done.wait (!%p540_p1), %s423_s6, 2048  }
  0xbc   : > { %653 = vsyncadd (!%p540_p1), %s423_s6, 4294965248  ;;  %s16_s19 = sadd.s32 1, %s684_s19   ;;  %s893_s12 = smov %s660_s13 }
  0xbd   : > { %p13_p2 = scmp.ge.s32.totalorder %s16_s19, 10   ;;  %s894_s13 = smov %s664_s14 }
  0xbe   : > { %s895_s14 = smov %s783_s30  ;;  %s896_s15 = smov %s676_s17 }
  0xbf   : > { %s897_s16 = smov %s680_s18  ;;  %s898_s17 = smov %s901_s22 }
  0xc0   : > { %s899_s18 = smov %s905_s23  ;;  %15 = sbr.rel (!%p13_p2) target bundleno = 5 (0x5), region = 78 }
  0xc7   :  { %428 = vsyncpa [#allocation3], 1 }
  0xc8   :  { %430 = vsyncpa [#allocation3 + $0x1], 1 }

// kernel: gated_bimodal_forward.2
= control target key start
LH: loop header
LB: loop body
LE: loop exit
PB: predicated region body
PF: predicated region fallthrough
CT: control target
= control target key end

     0   :  { %vm36_vm0 = vcmask 392192   ;;  %vm150_vm1 = vcmask 523264   ;;  %vm263_vm2 = vcmask 261120   ;;  %vm327_vm3 = vcmask 7168   ;;  %s669_s2 = inlined_call_operand.vmem [shape: f32[48,32], index: 2, kind: input, shape index: {}]   ;;  %s670_s3 = inlined_call_operand.vmem [shape: f32[64,32], index: 3, kind: input, shape index: {}]   ;;  %s671_s0 = inlined_call_operand.vmem [shape: f32[32,48], index: 0, kind: input, shape index: {}]   ;;  %s672_s1 = inlined_call_operand.vmem [shape: f32[32,64], index: 1, kind: input, shape index: {}]   ;;  %s673_s4 = inlined_call_operand.vmem [shape: f32[1,32], index: 4, kind: input, shape index: {}]   ;;  %s674_s5 = inlined_call_operand.vmem [shape: f32[1,32], index: 5, kind: input, shape index: {}]   ;;  %s675_s6 = inlined_call_operand.vmem [shape: f32[32,32], index: 6, kind: output, shape index: {0}]   ;;  %s676_s7 = inlined_call_operand.vmem [shape: f32[32,32], index: 7, kind: output, shape index: {1}]   ;;  %s677_s8 = inlined_call_operand.vmem [shape: f32[32,1], index: 8, kind: output, shape index: {2}]  }
   0x1   :  { %v30_v0 = vld [vmem:[%s669_s2] sm:$0xff]  ;;  %v31_v1 = vld [vmem:[%s669_s2 + $0x8] sm:$0xff]  ;;  %v32_v5 = vld [vmem:[%s669_s2 + $0x10] sm:$0xff] }
   0x2   :  { %v142_v2 = vld [vmem:[%s670_s3] sm:$0xff]  ;;  %v432_v3 = vpack.c.bf16 %v31_v1, %v30_v0  ;;  %v143_v4 = vld [vmem:[%s670_s3 + $0x8] sm:$0xff]  ;;  %v33_v6 = vld [vmem:[%s669_s2 + $0x18] sm:$0xff] }
   0x3   :  { %v444_v7 = vpack.c.bf16 %v143_v4, %v142_v2  ;;  %v436_v8 = vpack.c.bf16 %v33_v6, %v32_v5  ;;  %v144_v9 = vld [vmem:[%s670_s3 + $0x10] sm:$0xff]  ;;  %v145_v10 = vld [vmem:[%s670_s3 + $0x18] sm:$0xff]  ;;  %v34_v11 = vld [vmem:[%s669_s2 + $0x20] sm:$0xff] }
   0x4   :  { %433 = vmatprep.subr.bf16.mxu0 %v432_v3  ;;  %v448_v12 = vpack.c.bf16 %v145_v10, %v144_v9  ;;  %v35_v13 = vld [vmem:[%s669_s2 + $0x28] sm:$0xff]  ;;  %v146_v14 = vld [vmem:[%s670_s3 + $0x20] sm:$0xff]  ;;  %v148_v20 = vld [vmem:[%s670_s3 + $0x30] sm:$0xff] }
   0x5   :  { %v147_v15 = vld [vmem:[%s670_s3 + $0x28] sm:$0xff]  ;;  %445 = vmatprep.subr.bf16.mxu1 %v444_v7  ;;  %435 = vmatpush3.bf16.msra.mxu0 %v432_v3  ;;  %v26_v16 = vld [vmem:[%s671_s0] sm:$0xff]  ;;  %v440_v17 = vpack.c.bf16 %v35_v13, %v34_v11  ;;  %v149_v21 = vld [vmem:[%s670_s3 + $0x38] sm:$0xff] }
   0x6   :  { %447 = vmatpush3.bf16.msra.mxu1 %v444_v7  ;;  %437 = vmatprep.subr.bf16.mxu0 %v436_v8  ;;  %v138_v18 = vld [vmem:[%s672_s1] sm:$0xff]  ;;  %v452_v19 = vpack.c.bf16 %v147_v15, %v146_v14  ;;  %v456_v22 = vpack.c.bf16 %v149_v21, %v148_v20  ;;  %v27_v23 = vld [vmem:[%s671_s0 + $0x8] sm:$0xff]  ;;  %v28_v24 = vld [vmem:[%s671_s0 + $0x10] sm:$0xff] }
   0x7   :  { %449 = vmatprep.subr.bf16.mxu1 %v448_v12  ;;  %404 = vmatprep.mubr.msk.f32.mxu0 %vm36_vm0, %v26_v16  ;;  %v29_v25 = vld [vmem:[%s671_s0 + $0x18] sm:$0xff]  ;;  %v139_v26 = vld [vmem:[%s672_s1 + $0x8] sm:$0xff]  ;;  %v140_v27 = vld [vmem:[%s672_s1 + $0x10] sm:$0xff] }
   0x8   :  { %426 = vmatprep.mubr.msk.f32.mxu1 %vm150_vm1, %v138_v18  ;;  %v141_v28 = vld [vmem:[%s672_s1 + $0x18] sm:$0xff]  ;;  %v364_v36 = vld [vmem:[%s673_s4] ss:$0 sm:$0xff] }
   0x9   :  { %439 = vmatpush3.bf16.msra.mxu0 %v436_v8  ;;  %v365_v43 = vld [vmem:[%s674_s5] ss:$0 sm:$0xff] }
   0xa   :  { %451 = vmatpush3.bf16.msra.mxu1 %v448_v12  ;;  %441 = vmatprep.subr.bf16.mxu0 %v440_v17 }
   0xb   :  { %453 = vmatprep.subr.bf16.mxu1 %v452_v19 }
   0xd   :  { %443 = vmatpush3.bf16.msra.mxu0 %v440_v17 }
   0xe   :  { %455 = vmatpush3.bf16.msra.mxu1 %v452_v19 }
   0xf   :  { %457 = vmatprep.subr.bf16.mxu1 %v456_v22 }
  0x10   :  { %405 = vmatmul.mubr.msk.f32.vlgmr.msra.gmra.mrb[0].mxu0 %vm36_vm0, %v27_v23 }
  0x11   :  { %407 = vmatprep.mubr.msk.f32.mxu0 %vm36_vm0, %v28_v24 }
  0x12   :  { %459 = vmatpush3.bf16.msra.mxu1 %v456_v22 }
  0x14   :  { %408 = vmatmul.mubr.msk.f32.gmra.mrb[2].mxu0 %vm36_vm0, %v29_v25 }
  0x15   :  { %427 = vmatmul.mubr.msk.f32.vlgmr.msra.gmra.mrb[0].mxu1 %vm150_vm1, %v139_v26 }
  0x16   :  { %429 = vmatprep.mubr.msk.f32.mxu1 %vm150_vm1, %v140_v27 }
  0x19   :  { %430 = vmatmul.mubr.msk.f32.gmra.mrb[2].mxu1 %vm150_vm1, %v141_v28 }
  0xe3   :  { %v406_v29 = vpop.f32.mrb[0].mxu0 }
  0xe4   :  { %460 = vtanh.f32 %v406_v29  ;;  %v115_v30 = vpop.f32.mrb[1].mxu0 }
  0xe5   :  { %462 = vtanh.f32 %v115_v30 }
  0xe7   :  { %v409_v31 = vpop.f32.mrb[2].mxu0 }
  0xe8   :  { %464 = vtanh.f32 %v409_v31  ;;  %v428_v32 = vpop.f32.mrb[0].mxu1  ;;  %v125_v33 = vpop.f32.mrb[3].mxu0 }
  0xe9   :  { %466 = vtanh.f32 %v428_v32  ;;  %v229_v34 = vpop.f32.mrb[1].mxu1 }
  0xea   :  { %468 = vtanh.f32 %v229_v34 }
  0xeb   :  { %470 = vtanh.f32 %v125_v33 }
  0xec   :  { %v431_v35 = vpop.f32.mrb[2].mxu1 }
  0xed   :  { %472 = vtanh.f32 %v431_v35  ;;  %v239_v37 = vpop.f32.mrb[3].mxu1 }
  0xee   :  { %v461_v38 = vpop.eup %460  ;;  %474 = vtanh.f32 %v239_v37 }
  0xef   :  { %v463_v39 = vpop.eup %462  ;;  %v260_v40 = vmul.f32 %v461_v38, %v364_v36 }
  0xf0   :  { %v259_v42 = vmul.f32 %v463_v39, %v364_v36 }
  0xf1   :  { %v267_v41 = vsel %vm263_vm2, %v260_v40, 0.0 }
  0xf2   :  { %v465_v44 = vpop.eup %464  ;;  %268 = vadd.xlane.f32.xlu0 %v267_v41  ;;  %v264_v50 = vsel %vm263_vm2, %v259_v42, 0.0 }
  0xf3   :  { %v467_v45 = vpop.eup %466  ;;  %v262_v46 = vmul.f32 %v465_v44, %v364_v36 }
  0xf4   :  { %333 = vst.msk [vmem:[%s675_s6 + $0x8] sm:$0xff] %vm263_vm2, %v467_v45  ;;  %v337_v47 = vsub.f32 %v461_v38, %v467_v45  ;;  %v284_v48 = vmul.f32 %v467_v45, %v365_v43  ;;  %v469_v49 = vpop.eup %468 }
  0xf5   :  { %v273_v51 = vsel %vm263_vm2, %v262_v46, 0.0  ;;  %v471_v52 = vpop.eup %470  ;;  %332 = vst.msk [vmem:[%s675_s6] sm:$0xff] %vm263_vm2, %v469_v49  ;;  %v336_v53 = vsub.f32 %v463_v39, %v469_v49  ;;  %v283_v54 = vmul.f32 %v469_v49, %v365_v43 }
  0xf6   :  { %341 = vst.msk [vmem:[%s676_s7 + $0x8] sm:$0xff] %vm263_vm2, %v337_v47  ;;  %265 = vadd.xlane.f32.xlu0 %v264_v50  ;;  %274 = vadd.xlane.f32.xlu1 %v273_v51  ;;  %v290_v56 = vsel %vm263_vm2, %v284_v48, 0.0  ;;  %v261_v62 = vmul.f32 %v471_v52, %v364_v36 }
  0xf7   :  { %v473_v55 = vpop.eup %472  ;;  %340 = vst.msk [vmem:[%s676_s7] sm:$0xff] %vm263_vm2, %v336_v53  ;;  %v287_v59 = vsel %vm263_vm2, %v283_v54, 0.0 }
  0xf8   :  { %v475_v57 = vpop.eup %474  ;;  %335 = vst.msk [vmem:[%s675_s6 + $0x18] sm:$0xff] %vm263_vm2, %v473_v55  ;;  %v339_v58 = vsub.f32 %v465_v44, %v473_v55  ;;  %v286_v0 = vmul.f32 %v473_v55, %v365_v43  ;;  %v270_v1 = vsel %vm263_vm2, %v261_v62, 0.0 }
  0xf9   :  { %334 = vst.msk [vmem:[%s675_s6 + $0x10] sm:$0xff] %vm263_vm2, %v475_v57  ;;  %v338_v60 = vsub.f32 %v471_v52, %v475_v57  ;;  %v285_v61 = vmul.f32 %v475_v57, %v365_v43 }
  0xfa   :  { %343 = vst.msk [vmem:[%s676_s7 + $0x18] sm:$0xff] %vm263_vm2, %v339_v58  ;;  %288 = vadd.xlane.f32.xlu0 %v287_v59  ;;  %291 = vadd.xlane.f32.xlu1 %v290_v56  ;;  %v296_v2 = vsel %vm263_vm2, %v286_v0, 0.0 }
  0xfb   :  { %342 = vst.msk [vmem:[%s676_s7 + $0x10] sm:$0xff] %vm263_vm2, %v338_v60  ;;  %v293_v63 = vsel %vm263_vm2, %v285_v61, 0.0 }
  0xfe   :  { %294 = vadd.xlane.f32.xlu0 %v293_v63  ;;  %271 = vadd.xlane.f32.xlu1 %v270_v1 }
 0x102   :  { %297 = vadd.xlane.f32.xlu1 %v296_v2 }
 0x17f   :  { %v269_v3 = vpop.xlane.xlu0 %268 }
 0x183   :  { %v266_v4 = vpop.xlane.xlu0 %265  ;;  %v275_v5 = vpop.xlane.xlu1 %274 }
 0x187   :  { %v289_v6 = vpop.xlane.xlu0 %288  ;;  %v292_v7 = vpop.xlane.xlu1 %291 }
 0x188   :  { %v299_v8 = vadd.f32 %v289_v6, %v266_v4  ;;  %v300_v9 = vadd.f32 %v292_v7, %v269_v3 }
 0x18a   :  { %v366_v10 = vmul.f32 -1.442695, %v299_v8  ;;  %v367_v11 = vmul.f32 -1.442695, %v300_v9 }
 0x18b   :  { %v295_v12 = vpop.xlane.xlu0 %294  ;;  %v272_v13 = vpop.xlane.xlu1 %271 }
 0x18c   :  { %476 = vpow2.f32 %v366_v10  ;;  %v301_v14 = vadd.f32 %v295_v12, %v272_v13 }
 0x18d   :  { %478 = vpow2.f32 %v367_v11 }
 0x18e   :  { %v368_v15 = vmul.f32 -1.442695, %v301_v14 }
 0x18f   :  { %v298_v16 = vpop.xlane.xlu1 %297 }
 0x190   :  { %480 = vpow2.f32 %v368_v15  ;;  %v302_v17 = vadd.f32 %v298_v16, %v275_v5 }
 0x192   :  { %v369_v18 = vmul.f32 -1.442695, %v302_v17 }
 0x194   :  { %482 = vpow2.f32 %v369_v18 }
 0x196   :  { %v477_v19 = vpop.eup %476 }
 0x197   :  { %v479_v20 = vpop.eup %478  ;;  %v315_v21 = vadd.f32 1.0, %v477_v19 }
 0x198   :  { %v316_v22 = vadd.f32 1.0, %v479_v20 }
 0x199   :  { %484 = vrcp.f32 %v315_v21 }
 0x19a   :  { %v481_v23 = vpop.eup %480  ;;  %486 = vrcp.f32 %v316_v22 }
 0x19b   :  { %v317_v24 = vadd.f32 1.0, %v481_v23 }
 0x19d   :  { %488 = vrcp.f32 %v317_v24 }
 0x19e   :  { %v483_v25 = vpop.eup %482 }
 0x19f   :  { %v318_v26 = vadd.f32 1.0, %v483_v25 }
 0x1a1   :  { %490 = vrcp.f32 %v318_v26 }
 0x1a3   :  { %v485_v27 = vpop.eup %484 }
 0x1a4   :  { %v487_v28 = vpop.eup %486  ;;  %328 = vst.msk [vmem:[%s677_s8] sm:$0xff] %vm327_vm3, %v485_v27 }
 0x1a5   :  { %329 = vst.msk [vmem:[%s677_s8 + $0x8] sm:$0xff] %vm327_vm3, %v487_v28 }
 0x1a7   :  { %v489_v29 = vpop.eup %488 }
 0x1a8   :  { %330 = vst.msk [vmem:[%s677_s8 + $0x10] sm:$0xff] %vm327_vm3, %v489_v29 }
 0x1ab   :  { %v491_v30 = vpop.eup %490 }
 0x1ac   :  { %331 = vst.msk [vmem:[%s677_s8 + $0x18] sm:$0xff] %vm327_vm3, %v491_v30 }

</bundles_post_ra>
